<compile_context>
chip_gen: v7x
topology: tpu7x:2x2x1
jax: 0.10.0
libtpu: 0.0.40
codegen_flags: <defaults>
</compile_context>

<pallas_src>
import functools

import jax
import jax.numpy as jnp
from jax.experimental import pallas as pl
from jax.experimental.pallas import tpu as pltpu


def _round_up(v, m):
    return ((v + m - 1) // m) * m


def gating_kernel(x_ref, w_ref, shift_ref, o_ref):
    x = x_ref[...]                                            # (tm, Dp) bf16
    # MXU: bf16 @ bf16 -> f32 accumulation. BN scale already folded into W.
    gates = jnp.dot(x, w_ref[...], preferred_element_type=jnp.float32)
    gates = gates + shift_ref[...]                            # folded BN shift / bias
    # sigmoid: exp and the divide both live on the EUP slot (off the VALU path).
    gates = pl.reciprocal(1.0 + jnp.exp(-gates), approx=True)
    # Gating multiply fused as the matmul epilogue -> single lane-dense store.
    o_ref[...] = (x.astype(jnp.float32) * gates).astype(o_ref.dtype)


def gating_context(x, gating_weights, *, gamma=None, beta=None,
                   running_mean=None, running_var=None, gating_biases=None,
                   add_batch_norm=True, eps=1e-5, tm=1024):
    """Forward pass of GatingContext (eval-mode BatchNorm)."""
    B, dim = x.shape
    assert gating_weights.shape == (dim, dim)

    # ---- parameter folding (cheap; constant-folds / fuses under jit) --------
    if add_batch_norm:
        inv = gamma / jnp.sqrt(running_var + eps)
        w_folded = gating_weights * inv[None, :]          # BN scale into W cols
        shift = (beta - running_mean * inv).astype(jnp.float32)
    else:
        w_folded = gating_weights
        shift = gating_biases.astype(jnp.float32)

    # ---- lane-dense column padding only when actually needed ----------------
    Dp = _round_up(dim, 128)
    if Dp != dim:
        x_in = jnp.pad(x, ((0, 0), (0, Dp - dim)))
        w_in = jnp.pad(w_folded, ((0, Dp - dim), (0, Dp - dim)))
        shift_in = jnp.pad(shift, (0, Dp - dim))
    else:
        x_in, w_in, shift_in = x, w_folded, shift

    # bf16 operands for the MXU; epilogue stays in f32 inside the kernel.
    x_bf = x_in.astype(jnp.bfloat16)
    w_bf = w_in.astype(jnp.bfloat16)
    shift_in = shift_in.reshape(1, Dp)

    # ---- row tiling: no row padding; minimize dead rows in the last block ---
    n_blocks = -(-B // tm)                        # how many blocks at most-tm rows
    tm_eff = min(_round_up(-(-B // n_blocks), 8), _round_up(B, 8))
    grid0 = -(-B // tm_eff)

    out_dtype = x.dtype
    out_itemsize = jnp.dtype(out_dtype).itemsize

    # ---- VMEM budget from the actual footprint (double-buffered I/O) --------
    footprint = (2 * tm_eff * Dp * 2            # x tiles (bf16, double-buffered)
                 + 2 * Dp * Dp * 2              # weight (bf16, double-buffered)
                 + 2 * Dp * 4                   # shift row
                 + 2 * tm_eff * Dp * out_itemsize)  # output tiles
    vmem_limit = min(max(int(footprint * 1.25) + (4 << 20), 16 << 20), 100 << 20)

    cost = pl.CostEstimate(
        flops=2 * B * dim * dim + 4 * B * dim,
        transcendentals=B * dim,
        bytes_accessed=(B * Dp * 2 + Dp * Dp * 2 + Dp * 4 + B * Dp * out_itemsize),
    )

    out = pl.pallas_call(
        gating_kernel,
        out_shape=jax.ShapeDtypeStruct((B, Dp), out_dtype),
        grid=(grid0,),
        in_specs=[
            pl.BlockSpec((tm_eff, Dp), lambda i: (i, 0)),   # x tile (LHS + gating mul)
            pl.BlockSpec((Dp, Dp), lambda i: (0, 0)),       # folded weight, VMEM-resident
            pl.BlockSpec((1, Dp), lambda i: (0, 0)),        # folded BN shift / bias
        ],
        out_specs=pl.BlockSpec((tm_eff, Dp), lambda i: (i, 0)),
        compiler_params=pltpu.CompilerParams(
            dimension_semantics=("parallel",),
            vmem_limit_bytes=vmem_limit),
        cost_estimate=cost,
    )(x_bf, w_bf, shift_in)

    return out if Dp == dim else out[:, :dim]


def _reference(x, w, scale, shift):
    gates = x @ w
    gates = gates * scale[None, :] + shift[None, :]
    gates = 1.0 / (1.0 + jnp.exp(-gates))
    return x * gates


if __name__ == "__main__":
    key = jax.random.PRNGKey(0)
    k_x, k_w, k_g, k_b, k_m, k_v = jax.random.split(key, 6)

    B, dim = 16, 256
    eps = 1e-5

    x = jax.random.normal(k_x, (B, dim), dtype=jnp.float32)
    gating_weights = (jax.random.normal(k_w, (dim, dim), dtype=jnp.float32)
                      / jnp.sqrt(float(dim)))
    gamma = 1.0 + 0.1 * jax.random.normal(k_g, (dim,), dtype=jnp.float32)
    beta = 0.1 * jax.random.normal(k_b, (dim,), dtype=jnp.float32)
    running_mean = 0.1 * jax.random.normal(k_m, (dim,), dtype=jnp.float32)
    running_var = 1.0 + 0.1 * jax.random.uniform(k_v, (dim,), dtype=jnp.float32)

    fwd = jax.jit(functools.partial(gating_context,
                                    add_batch_norm=True, eps=eps))
    out = fwd(x, gating_weights, gamma=gamma, beta=beta,
              running_mean=running_mean, running_var=running_var)
    out = jax.block_until_ready(out)

    inv = gamma / jnp.sqrt(running_var + eps)
    ref = _reference(x, gating_weights, inv, beta - running_mean * inv)

    assert out.shape == (B, dim)
    # bf16 MXU operands + approx EUP reciprocal -> loosen tolerance vs f32 ref.
    assert jnp.allclose(out, ref, atol=2e-2, rtol=2e-2), (
        float(jnp.max(jnp.abs(out - ref))))
    print("KERNEL_OK")
</pallas_src>

<mosaic_0001>
module attributes {stable_mosaic.version = 11 : i64} {
  func.func @gating_kernel(%arg0: i32, %arg1: memref<16x256xbf16, #tpu.memory_space<vmem>>, %arg2: memref<256x256xbf16, #tpu.memory_space<vmem>>, %arg3: memref<1x256xf32, #tpu.memory_space<vmem>>, %arg4: memref<16x256xf32, #tpu.memory_space<vmem>>) attributes {dimension_semantics = [#tpu.dimension_semantics<parallel>], iteration_bounds = array<i64: 1>, scalar_prefetch = 0 : i64, scratch_operands = 0 : i64, tpu.core_type = #tpu.core_type<tc>, window_params = [{transform_indices = @transform_0, window_bounds = array<i64: 16, 256>}, {pipeline_mode = #tpu.pipeline_mode<synchronous>, transform_indices = @transform_1, window_bounds = array<i64: 256, 256>}, {pipeline_mode = #tpu.pipeline_mode<synchronous>, transform_indices = @transform_2, window_bounds = array<i64: 1, 256>}, {transform_indices = @transform_3, window_bounds = array<i64: 16, 256>}]} {
    %c0 = arith.constant 0 : index
    %c0_0 = arith.constant 0 : index
    %0 = vector.load %arg1[%c0, %c0_0] : memref<16x256xbf16, #tpu.memory_space<vmem>>, vector<16x256xbf16>
    %c0_1 = arith.constant 0 : index
    %c0_2 = arith.constant 0 : index
    %1 = vector.load %arg2[%c0_1, %c0_2] : memref<256x256xbf16, #tpu.memory_space<vmem>>, vector<256x256xbf16>
    %cst = arith.constant dense<0.000000e+00> : vector<16x256xf32>
    %2 = tpu.matmul %0, %1, %cst {dimension_numbers = #tpu.dot_dimension_numbers<[1], [0], [0], [1], [0, 0, 1, 1], [], []>} : vector<16x256xbf16>, vector<256x256xbf16>, vector<16x256xf32> -> vector<16x256xf32>
    %c0_3 = arith.constant 0 : index
    %c0_4 = arith.constant 0 : index
    %3 = vector.load %arg3[%c0_3, %c0_4] : memref<1x256xf32, #tpu.memory_space<vmem>>, vector<1x256xf32>
    %4 = vector.broadcast %3 : vector<1x256xf32> to vector<16x256xf32>
    %5 = arith.addf %2, %4 : vector<16x256xf32>
    %cst_5 = arith.constant 0.000000e+00 : f32
    %6 = vector.broadcast %cst_5 : f32 to vector<16x256xf32>
    %7 = arith.subf %6, %5 : vector<16x256xf32>
    %8 = math.exp %7 : vector<16x256xf32>
    %cst_6 = arith.constant 1.000000e+00 : f32
    %9 = vector.broadcast %cst_6 : f32 to vector<16x256xf32>
    %10 = arith.addf %9, %8 : vector<16x256xf32>
    %11 = tpu.reciprocal %10 {approx = true} : vector<16x256xf32> -> vector<16x256xf32>
    %12 = arith.extf %0 : vector<16x256xbf16> to vector<16x256xf32>
    %13 = arith.mulf %12, %11 : vector<16x256xf32>
    %c0_7 = arith.constant 0 : index
    %c0_8 = arith.constant 0 : index
    %14 = vector.load %arg4[%c0_7, %c0_8] : memref<16x256xf32, #tpu.memory_space<vmem>>, vector<16x256xf32>
    tpu.vector_store %arg4[%c0_7, %c0_8], %13 {strides = array<i32>} : memref<16x256xf32, #tpu.memory_space<vmem>>, vector<16x256xf32>,
    return
  }
  func.func @transform_0(%arg0: i32) -> (i32, i32) {
    %c0_i32 = arith.constant 0 : i32
    %c0_i32_0 = arith.constant 0 : i32
    return %arg0, %c0_i32 : i32, i32
  }
  func.func @transform_1(%arg0: i32) -> (i32, i32) {
    %c0_i32 = arith.constant 0 : i32
    %c0_i32_0 = arith.constant 0 : i32
    %c0_i32_1 = arith.constant 0 : i32
    return %c0_i32, %c0_i32_0 : i32, i32
  }
  func.func @transform_2(%arg0: i32) -> (i32, i32) {
    %c0_i32 = arith.constant 0 : i32
    %c0_i32_0 = arith.constant 0 : i32
    %c0_i32_1 = arith.constant 0 : i32
    return %c0_i32, %c0_i32_0 : i32, i32
  }
  func.func @transform_3(%arg0: i32) -> (i32, i32) {
    %c0_i32 = arith.constant 0 : i32
    %c0_i32_0 = arith.constant 0 : i32
    return %arg0, %c0_i32 : i32, i32
  }
}

</mosaic_0001>

<bundles_post_ra>
// kernel: gating_context.1
= control target key start
LH: loop header
LB: loop body
LE: loop exit
PB: predicated region body
PF: predicated region fallthrough
CT: control target
= control target key end

     0   :  { %s601_s0 = inlined_call_operand.vmem [shape: bf16[16,256], index: 0, kind: input, shape index: {}]   ;;  %s602_s1 = inlined_call_operand.vmem [shape: bf16[256,256], index: 1, kind: input, shape index: {}]   ;;  %s603_s2 = inlined_call_operand.vmem [shape: f32[1,256], index: 2, kind: input, shape index: {}]   ;;  %s604_s3 = inlined_call_operand.hbm [shape: f32[16,256], index: 3, kind: output, shape index: {}]  }
   0x1   :  { %v359_v0 = vld [vmem:[%s602_s1 + $0x4] ss:$8 sps:$4 sm:$0xff]   ;;  %v361_v1 = vld [vmem:[%s602_s1] ss:$8 sps:$4 sm:$0xff]   ;;  %v362_v2 = vld [vmem:[%s602_s1 + $0x14] ss:$8 sps:$4 sm:$0xff]  }
   0x2   :  { %231 = vmatprep.subr.bf16.mxu0 %v359_v0  ;;  %v364_v3 = vld [vmem:[%s602_s1 + $0x10] ss:$8 sps:$4 sm:$0xff]   ;;  %v365_v4 = vld [vmem:[%s602_s1 + $0x24] ss:$8 sps:$4 sm:$0xff]   ;;  %v367_v5 = vld [vmem:[%s602_s1 + $0x20] ss:$8 sps:$4 sm:$0xff]  }
   0x3   :  { %232 = vmatpush1.bf16.msra.mxu0 %v361_v1  ;;  %v368_v6 = vld [vmem:[%s602_s1 + $0x34] ss:$8 sps:$4 sm:$0xff]   ;;  %v370_v7 = vld [vmem:[%s602_s1 + $0x30] ss:$8 sps:$4 sm:$0xff]   ;;  %v371_v8 = vld [vmem:[%s602_s1 + $0x44] ss:$8 sps:$4 sm:$0xff]  }
   0x4   :  { %233 = vmatprep.subr.bf16.mxu0 %v362_v2  ;;  %v373_v9 = vld [vmem:[%s602_s1 + $0x40] ss:$8 sps:$4 sm:$0xff]   ;;  %v374_v10 = vld [vmem:[%s602_s1 + $0x54] ss:$8 sps:$4 sm:$0xff]   ;;  %v376_v11 = vld [vmem:[%s602_s1 + $0x50] ss:$8 sps:$4 sm:$0xff]  }
   0x5   :  { %v377_v12 = vld [vmem:[%s602_s1 + $0x64] ss:$8 sps:$4 sm:$0xff]  }
   0x6   :  { %v514_v13 = vld [vmem:[%s601_s0] sm:$0xff]  ;;  %v519_v14 = vld [vmem:[%s601_s0 + $0x8] sm:$0xff] }
   0x7   :  { %234 = vmatpush1.bf16.msra.mxu0 %v364_v3  ;;  %v323_v15 = vcombine.high %v514_v13, %v519_v14 }
   0x8   :  { %235 = vmatprep.subr.bf16.mxu0 %v365_v4 }
   0xb   :  { %236 = vmatpush1.bf16.msra.mxu0 %v367_v5 }
   0xc   :  { %237 = vmatprep.subr.bf16.mxu0 %v368_v6 }
   0xf   :  { %238 = vmatpush1.bf16.msra.mxu0 %v370_v7 }
  0x10   :  { %239 = vmatprep.subr.bf16.mxu0 %v371_v8 }
  0x13   :  { %240 = vmatpush1.bf16.msra.mxu0 %v373_v9 }
  0x14   :  { %241 = vmatprep.subr.bf16.mxu0 %v374_v10 }
  0x15   :  { %8 = vsyncpa [#allocation3], 0  ;;  %v379_v16 = vld [vmem:[%s602_s1 + $0x60] ss:$8 sps:$4 sm:$0xff]   ;;  %v380_v17 = vld [vmem:[%s602_s1 + $0x74] ss:$8 sps:$4 sm:$0xff]   ;;  %263 = vmatprep.mubr.bf16.mxu0 %v323_v15  ;;  %v322_v35 = vcombine.low %v514_v13, %v519_v14  ;;  %v51_v36 = vlaneseq  ;;  %v294_v3 = vunpack.c.l.bf16 %v514_v13  ;;  %v295_v4 = vunpack.c.h.bf16 %v514_v13 }
  0x16   :  { %v382_v18 = vld [vmem:[%s602_s1 + $0x70] ss:$8 sps:$4 sm:$0xff]   ;;  %v383_v19 = vld [vmem:[%s602_s1 + $0x84] ss:$8 sps:$4 sm:$0xff]   ;;  %v385_v20 = vld [vmem:[%s602_s1 + $0x80] ss:$8 sps:$4 sm:$0xff]   ;;  %v296_v5 = vunpack.c.l.bf16 %v519_v14  ;;  %v297_v7 = vunpack.c.h.bf16 %v519_v14 }
  0x17   :  { %242 = vmatpush1.bf16.msra.mxu0 %v376_v11  ;;  %v386_v21 = vld [vmem:[%s602_s1 + $0x94] ss:$8 sps:$4 sm:$0xff]   ;;  %v388_v22 = vld [vmem:[%s602_s1 + $0x90] ss:$8 sps:$4 sm:$0xff]   ;;  %v389_v23 = vld [vmem:[%s602_s1 + $0xa4] ss:$8 sps:$4 sm:$0xff]  }
  0x18   :  { %243 = vmatprep.subr.bf16.mxu0 %v377_v12  ;;  %v391_v24 = vld [vmem:[%s602_s1 + $0xa0] ss:$8 sps:$4 sm:$0xff]   ;;  %v392_v25 = vld [vmem:[%s602_s1 + $0xb4] ss:$8 sps:$4 sm:$0xff]   ;;  %v394_v26 = vld [vmem:[%s602_s1 + $0xb0] ss:$8 sps:$4 sm:$0xff]  }
  0x19   :  { %v395_v27 = vld [vmem:[%s602_s1 + $0xc4] ss:$8 sps:$4 sm:$0xff]   ;;  %v397_v28 = vld [vmem:[%s602_s1 + $0xc0] ss:$8 sps:$4 sm:$0xff]   ;;  %v398_v29 = vld [vmem:[%s602_s1 + $0xd4] ss:$8 sps:$4 sm:$0xff]  }
  0x1a   :  { %v400_v30 = vld [vmem:[%s602_s1 + $0xd0] ss:$8 sps:$4 sm:$0xff]   ;;  %v401_v31 = vld [vmem:[%s602_s1 + $0xe4] ss:$8 sps:$4 sm:$0xff]   ;;  %v403_v32 = vld [vmem:[%s602_s1 + $0xe0] ss:$8 sps:$4 sm:$0xff]  }
  0x1b   :  { %244 = vmatpush1.bf16.msra.mxu0 %v379_v16  ;;  %v404_v33 = vld [vmem:[%s602_s1 + $0xf4] ss:$8 sps:$4 sm:$0xff]   ;;  %v406_v34 = vld [vmem:[%s602_s1 + $0xf0] ss:$8 sps:$4 sm:$0xff]   ;;  %v52_v37 = vshrl.u32 %v51_v36, 7  ;;  %s449_s1 = smov [#allocation2]  }
  0x1c   :  { %245 = vmatprep.subr.bf16.mxu0 %v380_v17  ;;  %v49_v39 = vld [vmem:[%s603_s2] sm:$0x3]  ;;  %s311_s2 = sshll.u32 %s449_s1, 4  ;;  %s312_s2 = int_to_ptr.vmem [resolvable:$true] %s311_s2 }
  0x1d   :  { %v53_v38 = vsub.s32 0, %v52_v37  ;;  %v57_v40 = vsub.s32 1, %v52_v37  ;;  %s425_s26 = scalar_lea.vmem %s312_s2, 512  ;;  %p430_p1 = scmp.lt.s32.totalorder %s312_s2, %s312_s2 }
  0x1e   :  { %p426_p0 = scmp.ne.s32.totalorder %s312_s2, %s425_s26  ;;  %p431_p2 = scmp.lt.s32.totalorder %s425_s26, %s425_s26 }
  0x1f   :  { %246 = vmatpush1.bf16.msra.mxu0 %v382_v18  ;;  %v54_v41 = vrot.slane %v49_v39, %v53_v38  ;;  %v58_v42 = vrot.slane %v49_v39, %v57_v40 }
  0x20   :  { %247 = vmatprep.subr.bf16.mxu0 %v383_v19  ;;  %p432_p3 = por %p431_p2, %p430_p1 }
  0x22   :  { %p433_p4 = pnand %p432_p3, %p426_p0 }
  0x23   :  { %248 = vmatpush1.bf16.msra.mxu0 %v385_v20 }
  0x24   :  { %249 = vmatprep.subr.bf16.mxu0 %v386_v21 }
  0x27   :  { %250 = vmatpush1.bf16.msra.mxu0 %v388_v22 }
  0x28   :  { %251 = vmatprep.subr.bf16.mxu0 %v389_v23 }
  0x2b   :  { %252 = vmatpush1.bf16.msra.mxu0 %v391_v24 }
  0x2c   :  { %253 = vmatprep.subr.bf16.mxu0 %v392_v25 }
  0x2f   :  { %254 = vmatpush1.bf16.msra.mxu0 %v394_v26 }
  0x30   :  { %255 = vmatprep.subr.bf16.mxu0 %v395_v27 }
  0x33   :  { %256 = vmatpush1.bf16.msra.mxu0 %v397_v28 }
  0x34   :  { %257 = vmatprep.subr.bf16.mxu0 %v398_v29 }
  0x37   :  { %258 = vmatpush1.bf16.msra.mxu0 %v400_v30 }
  0x38   :  { %259 = vmatprep.subr.bf16.mxu0 %v401_v31 }
  0x3b   :  { %260 = vmatpush1.bf16.msra.mxu0 %v403_v32 }
  0x3c   :  { %261 = vmatprep.subr.bf16.mxu0 %v404_v33 }
  0x3f   :  { %262 = vmatpush1.bf16.msra.mxu0 %v406_v34 }
  0x42   :  { %264 = vmatmul.mubr.bf16.vlgmr.msra.gmra.mrb[0].mxu0 %v322_v35 }
 0x115   :  { %v265_v43 = vpop.f32.mrb[0].mxu0 }
 0x116   :  { %v266_v44 = vadd.f32 %v265_v43, %v54_v41  ;;  %v267_v45 = vpop.f32.mrb[1].mxu0 }
 0x117   :  { %v268_v46 = vadd.f32 %v267_v45, %v58_v42  ;;  %v269_v47 = vpop.f32.mrb[2].mxu0 }
 0x118   :  { %v274_v48 = vsub.f32 0.0, %v266_v44  ;;  %v270_v49 = vadd.f32 %v269_v47, %v54_v41  ;;  %v271_v50 = vpop.f32.mrb[3].mxu0 }
 0x119   :  { %v275_v51 = vsub.f32 0.0, %v268_v46  ;;  %v272_v52 = vadd.f32 %v271_v50, %v58_v42 }
 0x11a   :  { %v278_v53 = vmul.f32 1.442695, %v274_v48  ;;  %v276_v54 = vsub.f32 0.0, %v270_v49 }
 0x11b   :  { %v280_v55 = vmul.f32 1.442695, %v275_v51  ;;  %v277_v56 = vsub.f32 0.0, %v272_v52 }
 0x11c   :  { %409 = vpow2.f32 %v278_v53  ;;  %v282_v57 = vmul.f32 1.442695, %v276_v54 }
 0x11d   :  { %411 = vpow2.f32 %v280_v55  ;;  %v284_v58 = vmul.f32 1.442695, %v277_v56 }
 0x11e   :  { %413 = vpow2.f32 %v282_v57 }
 0x11f   :  { %415 = vpow2.f32 %v284_v58 }
 0x126   :  { %v410_v59 = vpop.eup %409 }
 0x127   :  { %v412_v60 = vpop.eup %411  ;;  %v286_v61 = vadd.f32 1.0, %v410_v59 }
 0x128   :  { %v414_v62 = vpop.eup %413  ;;  %v287_v63 = vadd.f32 1.0, %v412_v60 }
 0x129   :  { %v416_v0 = vpop.eup %415  ;;  %417 = vrcp.f32 %v286_v61  ;;  %v288_v1 = vadd.f32 1.0, %v414_v62 }
 0x12a   :  { %419 = vrcp.f32 %v287_v63  ;;  %v289_v2 = vadd.f32 1.0, %v416_v0 }
 0x12b   :  { %421 = vrcp.f32 %v288_v1 }
 0x12c   :  { %423 = vrcp.f32 %v289_v2 }
 0x133   :  { %v418_v6 = vpop.eup %417 }
 0x134   :  { %v420_v8 = vpop.eup %419  ;;  %v298_v9 = vmul.f32 %v418_v6, %v294_v3 }
 0x135   :  { %v422_v10 = vpop.eup %421  ;;  %v299_v11 = vmul.f32 %v420_v8, %v295_v4 }
 0x136   :  { %v424_v12 = vpop.eup %423  ;;  %v300_v15 = vmul.f32 %v422_v10, %v296_v5  ;;  %302 = vst [vmem:[#allocation2] sm:$0xff] %v298_v9 }
 0x137   :  { %v301_v16 = vmul.f32 %v424_v12, %v297_v7  ;;  %303 = vst [vmem:[#allocation2 + $0x8] sm:$0xff] %v299_v11 }
 0x138   :  { %304 = vst [vmem:[#allocation2 + $0x10] sm:$0xff] %v300_v15 }
 0x139   :  { %305 = vst [vmem:[#allocation2 + $0x18] sm:$0xff] %v301_v16 }
 0x13a   :  { %436 = shalt.err (!%p433_p4)
}
 0x13b   :  { %s437_s29 = scalar_lea.hbm %s604_s3, 512 }
 0x13c   :  { %p438_p5 = scmp.ne.s32.totalorder %s604_s3, %s437_s29  ;;  %p441_p6 = scmp.lt.u32.totalorder %s437_s29, %s604_s3 }
 0x13e   :  { %p443_p7 = pnand %p441_p6, %p438_p5 }
 0x140   :  { %446 = shalt.err (!%p443_p7)
}
 0x141   :  { %s450_s7 = smov 256   ;;  %s451_s8 = smov 16  }
 0x142   :  { %317 = dma.vmem_to_hbm [thread:$0]  %s312_s2, 512, %s604_s3, [#allocation3], %s450_s7, %s450_s7, %s451_s8  }
 0x143   :  { %447 = dma.done.wait [#allocation3], 512  }
 0x144   :  { %448 = vsyncadd [#allocation3], 4294966784 }
 0x145   :  { %321 = vsyncpa [#allocation3], 1 }

</bundles_post_ra>
